<compile_context>
chip_gen: v7x
topology: tpu7x:2x2x1
jax: 0.10.0
libtpu: 0.0.40
codegen_flags: <defaults>
</compile_context>

<pallas_src>
import numpy as np
import jax
import jax.numpy as jnp
from jax.experimental import pallas as pl
from jax.experimental.pallas import tpu as pltpu

SQRT_2PI = float(np.sqrt(2.0 * np.pi))
EPS = 1e-6  # keeps scale strictly positive after relu


# ---------------------------------------------------------------------------
# Fused Pallas kernel: softmax proportions + Normal component pdf
# ---------------------------------------------------------------------------
def _udm_fused_kernel(interval_ref, prop_ref, loc_ref, scale_ref, classes_ref,
                      prop_out_ref, comp_out_ref):
    """Block shapes per grid step:
      interval_ref : (1,)              SMEM scalar
      prop_ref     : (tile_s, C)       VMEM  raw proportion params
      loc_ref      : (tile_rows, 1)    VMEM  flattened (S*C, 1) locations
      scale_ref    : (tile_rows, 1)    VMEM  flattened (S*C, 1) raw scales
      classes_ref  : (1, K)            VMEM  resident phi grid (same block all steps)
      prop_out_ref : (tile_s, C)       VMEM
      comp_out_ref : (tile_rows, K)    VMEM  dense (S*C, K) output view
    """
    # --- proportions: softmax over component axis (tiny, per-sample) ---
    p = prop_ref[...]
    m = jnp.max(p, axis=-1, keepdims=True)
    e = jnp.exp(p - m)
    prop_out_ref[...] = e / jnp.sum(e, axis=-1, keepdims=True)

    # --- components: Normal pdf over the phi grid, scaled by interval_phi ---
    interval = interval_ref[0]
    loc = loc_ref[...]                                    # (tile_rows, 1)
    scale = jnp.maximum(scale_ref[...], 0.0) + EPS        # (tile_rows, 1)
    inv_scale = 1.0 / scale                               # per-row only (exact)
    coeff = inv_scale * (interval / SQRT_2PI)             # per-row factor
    x = (classes_ref[...] - loc) * inv_scale              # (tile_rows, K) broadcast
    comp_out_ref[...] = jnp.exp(-0.5 * x * x) * coeff


def _pick_tile_s(S, C, K, max_block_bytes=4 << 20):
    """Largest sample tile whose output block fits well in VMEM; prefer a grid
    with >= 2 steps so both v7x TensorCores get work."""
    divisors = [t for t in range(1, S + 1) if S % t == 0]
    # (8,128) rule: second-to-last block dims must be mult. of 8 or full-size.
    valid = [t for t in divisors if (t % 8 == 0 or t == S)]
    fits = [t for t in valid if t * C * K * 4 <= max_block_bytes] or [min(valid)]
    multi = [t for t in fits if S // t >= 2]
    return max(multi) if multi else max(fits)


# ---------------------------------------------------------------------------
# Wrapper (UDMModule.forward equivalent)
# ---------------------------------------------------------------------------
def udm_forward(prop_params, comp_params, classes_phi, interval_phi, *, tile_s=None):
    """prop_params: (S,1,C), comp_params: (S,2,C), classes_phi: (K,) 1-D grid."""
    S, _, C = prop_params.shape
    K = int(classes_phi.shape[-1])
    if tile_s is None:
        tile_s = _pick_tile_s(S, C, K)
    assert S % tile_s == 0 and (tile_s % 8 == 0 or tile_s == S)
    tile_rows = tile_s * C
    R = S * C

    props2d = prop_params.reshape(S, C)
    loc_flat = comp_params[:, 0, :].reshape(R, 1)       # tiny strided copy
    scale_flat = comp_params[:, 1, :].reshape(R, 1)
    classes2d = jnp.asarray(classes_phi, jnp.float32).reshape(1, K)
    interval = jnp.asarray(interval_phi, dtype=jnp.float32).reshape((1,))

    prop_out, comp_out = pl.pallas_call(
        _udm_fused_kernel,
        out_shape=(jax.ShapeDtypeStruct((S, C), jnp.float32),
                   jax.ShapeDtypeStruct((R, K), jnp.float32)),
        grid=(S // tile_s,),
        in_specs=[
            pl.BlockSpec(memory_space=pltpu.MemorySpace.SMEM),        # interval
            pl.BlockSpec((tile_s, C), lambda i: (i, 0)),              # prop params
            pl.BlockSpec((tile_rows, 1), lambda i: (i, 0)),           # loc
            pl.BlockSpec((tile_rows, 1), lambda i: (i, 0)),           # raw scale
            pl.BlockSpec((1, K), lambda i: (0, 0)),                   # phi grid (resident)
        ],
        out_specs=(
            pl.BlockSpec((tile_s, C), lambda i: (i, 0)),              # proportions
            pl.BlockSpec((tile_rows, K), lambda i: (i, 0)),           # components
        ),
        compiler_params=pltpu.CompilerParams(dimension_semantics=("parallel",)),
    )(interval, props2d, loc_flat, scale_flat, classes2d)

    return prop_out.reshape(S, 1, C), comp_out.reshape(S, C, K)


# Pure-JAX reference for correctness check (matches torch semantics).
def udm_forward_ref(prop_params, comp_params, classes_phi, interval_phi):
    proportions = jax.nn.softmax(prop_params, axis=2)
    loc = comp_params[:, 0, :][:, :, None]
    scale = (jnp.maximum(comp_params[:, 1, :], 0.0) + EPS)[:, :, None]
    x = (classes_phi.reshape(1, 1, -1) - loc) / scale
    components = jnp.exp(-0.5 * x * x) / (scale * SQRT_2PI) * interval_phi
    return proportions, components


# ---------------------------------------------------------------------------
if __name__ == "__main__":
    n_samples, n_components, n_classes = 16, 4, 128

    # --- deterministic "UDMModule.__init__" parameter setup ---
    key = jax.random.PRNGKey(0)
    k1, k2, k3 = jax.random.split(key, 3)

    classes_phi_1d = jnp.linspace(0.0, 10.0, n_classes, dtype=jnp.float32)
    interval_phi = float(
        abs((classes_phi_1d[0] - classes_phi_1d[-1]) / (n_classes - 1))
    )
    # NOTE: the torch module stores classes_phi.repeat(S, C, 1); the forward
    # math only needs the 1-D grid, so we never materialize the repeat.

    # ProportionModule._params: (S, 1, C)
    prop_params = jax.random.uniform(k1, (n_samples, 1, n_components),
                                     dtype=jnp.float32)
    # NormalKernel._params: (S, 2, C) — row 0 = locations, row 1 = raw scales
    locations = jax.random.uniform(k2, (n_samples, 1, n_components),
                                   minval=2.0, maxval=8.0, dtype=jnp.float32)
    scales = jax.random.uniform(k3, (n_samples, 1, n_components),
                                minval=0.5, maxval=2.0, dtype=jnp.float32)
    comp_params = jnp.concatenate([locations, scales], axis=1)

    fwd = jax.jit(udm_forward)
    proportions, components = fwd(prop_params, comp_params,
                                  classes_phi_1d, interval_phi)
    jax.block_until_ready((proportions, components))

    # correctness check vs pure-JAX reference
    p_ref, c_ref = udm_forward_ref(prop_params, comp_params,
                                   classes_phi_1d, interval_phi)
    np.testing.assert_allclose(np.asarray(proportions), np.asarray(p_ref),
                               rtol=1e-5, atol=1e-5)
    np.testing.assert_allclose(np.asarray(components), np.asarray(c_ref),
                               rtol=1e-5, atol=1e-5)

    assert proportions.shape == (n_samples, 1, n_components)
    assert components.shape == (n_samples, n_components, n_classes)

    print("KERNEL_OK")
</pallas_src>

<mosaic_0001>
module attributes {stable_mosaic.version = 11 : i64} {
  func.func @_udm_fused_kernel(%arg0: i32, %arg1: memref<1xf32, #tpu.memory_space<smem>>, %arg2: memref<8x4xf32, #tpu.memory_space<vmem>>, %arg3: memref<32x1xf32, #tpu.memory_space<vmem>>, %arg4: memref<32x1xf32, #tpu.memory_space<vmem>>, %arg5: memref<1x128xf32, #tpu.memory_space<vmem>>, %arg6: memref<8x4xf32, #tpu.memory_space<vmem>>, %arg7: memref<32x128xf32, #tpu.memory_space<vmem>>) attributes {dimension_semantics = [#tpu.dimension_semantics<parallel>], iteration_bounds = array<i64: 2>, scalar_prefetch = 0 : i64, scratch_operands = 0 : i64, tpu.core_type = #tpu.core_type<tc>, window_params = [{transform_indices = @transform_0, window_bounds = array<i64: 1>}, {transform_indices = @transform_1, window_bounds = array<i64: 8, 4>}, {transform_indices = @transform_2, window_bounds = array<i64: 32, 1>}, {transform_indices = @transform_3, window_bounds = array<i64: 32, 1>}, {pipeline_mode = #tpu.pipeline_mode<synchronous>, transform_indices = @transform_4, window_bounds = array<i64: 1, 128>}, {transform_indices = @transform_5, window_bounds = array<i64: 8, 4>}, {transform_indices = @transform_6, window_bounds = array<i64: 32, 128>}]} {
    %c0 = arith.constant 0 : index
    %c0_0 = arith.constant 0 : index
    %0 = vector.load %arg2[%c0, %c0_0] : memref<8x4xf32, #tpu.memory_space<vmem>>, vector<8x4xf32>
    %cst = arith.constant dense<0xFF800000> : vector<8xf32>
    %1 = vector.multi_reduction <maximumf>, %0, %cst [1] : vector<8x4xf32> to vector<8xf32>
    %2 = vector.shape_cast %1 : vector<8xf32> to vector<8x1xf32>
    %3 = vector.broadcast %2 : vector<8x1xf32> to vector<8x4xf32>
    %4 = arith.subf %0, %3 : vector<8x4xf32>
    %5 = math.exp %4 : vector<8x4xf32>
    %cst_1 = arith.constant dense<0.000000e+00> : vector<8xf32>
    %6 = vector.multi_reduction <add>, %5, %cst_1 [1] : vector<8x4xf32> to vector<8xf32>
    %7 = vector.shape_cast %6 : vector<8xf32> to vector<8x1xf32>
    %8 = vector.broadcast %7 : vector<8x1xf32> to vector<8x4xf32>
    %9 = arith.divf %5, %8 : vector<8x4xf32>
    %c0_2 = arith.constant 0 : index
    %c0_3 = arith.constant 0 : index
    %10 = vector.load %arg6[%c0_2, %c0_3] : memref<8x4xf32, #tpu.memory_space<vmem>>, vector<8x4xf32>
    tpu.vector_store %arg6[%c0_2, %c0_3], %9 {strides = array<i32>} : memref<8x4xf32, #tpu.memory_space<vmem>>, vector<8x4xf32>,
    %c0_4 = arith.constant 0 : index
    %11 = memref.load %arg1[%c0_4] : memref<1xf32, #tpu.memory_space<smem>>
    %c0_5 = arith.constant 0 : index
    %c0_6 = arith.constant 0 : index
    %12 = vector.load %arg3[%c0_5, %c0_6] : memref<32x1xf32, #tpu.memory_space<vmem>>, vector<32x1xf32>
    %c0_7 = arith.constant 0 : index
    %c0_8 = arith.constant 0 : index
    %13 = vector.load %arg4[%c0_7, %c0_8] : memref<32x1xf32, #tpu.memory_space<vmem>>, vector<32x1xf32>
    %cst_9 = arith.constant 0.000000e+00 : f32
    %14 = vector.broadcast %cst_9 : f32 to vector<32x1xf32>
    %15 = arith.maximumf %13, %14 : vector<32x1xf32>
    %cst_10 = arith.constant 9.99999997E-7 : f32
    %16 = vector.broadcast %cst_10 : f32 to vector<32x1xf32>
    %17 = arith.addf %15, %16 : vector<32x1xf32>
    %cst_11 = arith.constant 1.000000e+00 : f32
    %18 = vector.broadcast %cst_11 : f32 to vector<32x1xf32>
    %19 = arith.divf %18, %17 : vector<32x1xf32>
    %cst_12 = arith.constant 2.50662827 : f32
    %20 = arith.divf %11, %cst_12 : f32
    %21 = vector.broadcast %20 : f32 to vector<32x1xf32>
    %22 = arith.mulf %19, %21 : vector<32x1xf32>
    %c0_13 = arith.constant 0 : index
    %c0_14 = arith.constant 0 : index
    %23 = vector.load %arg5[%c0_13, %c0_14] : memref<1x128xf32, #tpu.memory_space<vmem>>, vector<1x128xf32>
    %24 = vector.broadcast %23 : vector<1x128xf32> to vector<32x128xf32>
    %25 = vector.broadcast %12 : vector<32x1xf32> to vector<32x128xf32>
    %26 = arith.subf %24, %25 : vector<32x128xf32>
    %27 = vector.broadcast %19 : vector<32x1xf32> to vector<32x128xf32>
    %28 = arith.mulf %26, %27 : vector<32x128xf32>
    %cst_15 = arith.constant -5.000000e-01 : f32
    %29 = vector.broadcast %cst_15 : f32 to vector<32x128xf32>
    %30 = arith.mulf %29, %28 : vector<32x128xf32>
    %31 = arith.mulf %30, %28 : vector<32x128xf32>
    %32 = math.exp %31 : vector<32x128xf32>
    %33 = vector.broadcast %22 : vector<32x1xf32> to vector<32x128xf32>
    %34 = arith.mulf %32, %33 : vector<32x128xf32>
    %c0_16 = arith.constant 0 : index
    %c0_17 = arith.constant 0 : index
    %35 = vector.load %arg7[%c0_16, %c0_17] : memref<32x128xf32, #tpu.memory_space<vmem>>, vector<32x128xf32>
    tpu.vector_store %arg7[%c0_16, %c0_17], %34 {strides = array<i32>} : memref<32x128xf32, #tpu.memory_space<vmem>>, vector<32x128xf32>,
    return
  }
  func.func @transform_0(%arg0: i32) -> i32 {
    %c0_i32 = arith.constant 0 : i32
    %c0_i32_0 = arith.constant 0 : i32
    return %c0_i32 : i32
  }
  func.func @transform_1(%arg0: i32) -> (i32, i32) {
    %c0_i32 = arith.constant 0 : i32
    %c0_i32_0 = arith.constant 0 : i32
    return %arg0, %c0_i32 : i32, i32
  }
  func.func @transform_2(%arg0: i32) -> (i32, i32) {
    %c0_i32 = arith.constant 0 : i32
    %c0_i32_0 = arith.constant 0 : i32
    return %arg0, %c0_i32 : i32, i32
  }
  func.func @transform_3(%arg0: i32) -> (i32, i32) {
    %c0_i32 = arith.constant 0 : i32
    %c0_i32_0 = arith.constant 0 : i32
    return %arg0, %c0_i32 : i32, i32
  }
  func.func @transform_4(%arg0: i32) -> (i32, i32) {
    %c0_i32 = arith.constant 0 : i32
    %c0_i32_0 = arith.constant 0 : i32
    %c0_i32_1 = arith.constant 0 : i32
    return %c0_i32, %c0_i32_0 : i32, i32
  }
  func.func @transform_5(%arg0: i32) -> (i32, i32) {
    %c0_i32 = arith.constant 0 : i32
    %c0_i32_0 = arith.constant 0 : i32
    return %arg0, %c0_i32 : i32, i32
  }
  func.func @transform_6(%arg0: i32) -> (i32, i32) {
    %c0_i32 = arith.constant 0 : i32
    %c0_i32_0 = arith.constant 0 : i32
    return %arg0, %c0_i32 : i32, i32
  }
}

</mosaic_0001>

<bundles_post_ra>
// kernel: squeeze.0
= control target key start
LH: loop header
LB: loop body
LE: loop exit
PB: predicated region body
PF: predicated region fallthrough
CT: control target
= control target key end

     0   :  { %vm3_vm0 = vcmask 7168   ;;  %s64_s10 = smov 127   ;;  %s65_s15 = smov 125   ;;  %s114_s0 = inlined_call_operand.vmem [shape: f32[16,1,4], index: 0, kind: input, shape index: {}]   ;;  %s115_s1 = inlined_call_operand.vmem [shape: f32[64,1], index: 1, kind: output, shape index: {}]  }
   0x1   :  { %v23_v0 = vld [vmem:[%s114_s0] sm:$0xff]   ;;  %v49_v1 = vld [vmem:[%s114_s0 + $0x8] sm:$0xff]   ;;  %s63_s0 = smov 126  }
   0x2   :  { %24 = vrot.lane.b32.xlu1 %v23_v0, %s63_s0  ;;  %11 = vrot.lane.b32.xlu0 %v23_v0, %s64_s10  ;;  %4 = vst.msk [vmem:[%s115_s1] ss:$4 sm:$0xff] %vm3_vm0, %v23_v0   ;;  %50 = vst.msk [vmem:[%s115_s1 + $0x20] ss:$4 sm:$0xff] %vm3_vm0, %v49_v1  }
   0x6   :  { %31 = vrot.lane.b32.xlu1 %v49_v1, %s63_s0  ;;  %18 = vrot.lane.b32.xlu0 %v49_v1, %s64_s10 }
   0xa   :  { %44 = vrot.lane.b32.xlu1 %v49_v1, %s65_s15  ;;  %37 = vrot.lane.b32.xlu0 %v23_v0, %s65_s15 }
  0x74   :  { %v25_v2 = vpop.permute.xlu1 %24   ;;  %v12_v3 = vpop.permute.xlu0 %11  }
  0x75   :  { %54 = vst.msk [vmem:[%s115_s1 + $0x2] ss:$4 sm:$0xff] %vm3_vm0, %v25_v2   ;;  %51 = vst.msk [vmem:[%s115_s1 + $0x1] ss:$4 sm:$0xff] %vm3_vm0, %v12_v3  }
  0x78   :  { %v32_v4 = vpop.permute.xlu1 %31   ;;  %v19_v5 = vpop.permute.xlu0 %18  }
  0x79   :  { %56 = vst.msk [vmem:[%s115_s1 + $0x22] ss:$4 sm:$0xff] %vm3_vm0, %v32_v4   ;;  %53 = vst.msk [vmem:[%s115_s1 + $0x21] ss:$4 sm:$0xff] %vm3_vm0, %v19_v5  }
  0x7c   :  { %v45_v6 = vpop.permute.xlu1 %44   ;;  %v38_v7 = vpop.permute.xlu0 %37  }
  0x7d   :  { %59 = vst.msk [vmem:[%s115_s1 + $0x23] ss:$4 sm:$0xff] %vm3_vm0, %v45_v6   ;;  %57 = vst.msk [vmem:[%s115_s1 + $0x3] ss:$4 sm:$0xff] %vm3_vm0, %v38_v7  }

// kernel: udm_forward.1
= control target key start
LH: loop header
LB: loop body
LE: loop exit
PB: predicated region body
PF: predicated region fallthrough
CT: control target
= control target key end

     0   :  { %s899_s0 = inlined_call_operand.<no memory space> [shape: f32[1], index: 0, kind: input, shape index: {}]   ;;  %s900_s1 = inlined_call_operand.vmem [shape: f32[16,4], index: 1, kind: input, shape index: {}]   ;;  %s901_s2 = inlined_call_operand.vmem [shape: f32[64,1], index: 2, kind: input, shape index: {}]   ;;  %s902_s3 = inlined_call_operand.vmem [shape: f32[64,1], index: 3, kind: input, shape index: {}]   ;;  %s903_s4 = inlined_call_operand.vmem [shape: f32[1,128], index: 4, kind: input, shape index: {}]   ;;  %s904_s5 = inlined_call_operand.vmem [shape: f32[16,4], index: 5, kind: output, shape index: {0}]   ;;  %s905_s6 = inlined_call_operand.hbm [shape: f32[64,128], index: 6, kind: output, shape index: {1}]  }
   0x1   :  { %12 = sst [smem:[#allocation2]] %s899_s0 }
   0x2   :  { %13 = vsyncpa [#allocation4], 0 }
   0x3   :  { %15 = vsyncpa [#allocation4 + $0x1], 0  ;;  %s769_s23 = smov 0   ;;  %s771_s24 = smov 0  }
   0x4   :  { %s773_s25 = smov 0   ;;  %s775_s26 = smov 0  }
   0x5 LB: > { %s790_s0 = sadd.s32 4294967295, %s725_s26   ;;  %s581_s27 = sadd.s32 4294967294, %s725_s26   ;;  %s725_s26 = sphi %s775_s26, %s911_s26   ;;  %s721_s25 = sphi %s773_s25, %s910_s25   ;;  %s717_s24 = sphi %s771_s24, %s909_s24   ;;  %s713_s23 = sphi %s769_s23, %s908_s23  }
   0x6   : > { %s794_s28 = sadd.s32 1, %s725_s26   ;;  %s174_s29 = sadd.s32 1, %s721_s25 }
   0x7   : > { %s171_s30 = ssub.s32 %s725_s26, %s794_s28  ;;  %p184_p0 = scmp.ne.s32.totalorder %s721_s25, %s717_s24 }
   0x8   : > { %p172_p1 = scmp.eq.s32.totalorder %s171_s30, 0  ;;  %p185_p2 = scmp.eq.s32.totalorder %s790_s0, 1 }
   0x9   : > { %p190_p3 = scmp.ne.s32.totalorder %s717_s24, %s713_s23  ;;  %p191_p4 = scmp.eq.s32.totalorder %s581_s27, 1 }
   0xa   : > { %s805_s7 = scalar_select %p172_p1, %s721_s25, %s174_s29  }
   0xb   : > { %p807_p5 = por %p185_p2, %p184_p0  ;;  %p811_p6 = por %p191_p4, %p190_p3 }
   0xc   : > { %p584_p7 = scmp.ge.s32.totalorder %s725_s26, 1  ;;  %p240_p8 = scmp.lt.s32.totalorder %s725_s26, 3 }
   0xe   : > { %p241_p9 = pnand %p584_p7, %p240_p8 }
   0xf   : > { %p283_p10 = scmp.lt.s32.totalorder (!%p241_p9), %s790_s0, 1  ;;  %s587_s10 = sshll.u32 (!%p241_p9), %s790_s0, 2  ;;  %v727_v0 = vmov (!%p241_p9), 0   ;;  %vm305_vm0 = vcmask (!%p241_p9), 31744   ;;  %v592_v32 = vld [vmem:[%s903_s4] ss:$0 sm:$0xff] (!%p241_p9) }
  0x10   : > { %244 = sbr.rel (%p241_p9) target bundleno = 343 (0x157), region = 40  ;;  %642 = vset.pattern.permute.xlu1 (!%p241_p9), %v727_v0  ;;  %p288_p11 = scmp.lt.s32.totalorder (!%p241_p9), %s587_s10, 7  ;;  %641 = vset.pattern.permute.xlu0 (!%p241_p9), %v727_v0 }
  0x11   : > { %s318_s27 = sld [smem:[#allocation2]] (!%p241_p9)  ;;  %s280_s13 = sand.u32 (!%p241_p9), 1, %s717_s24  }
  0x12   : > { %s585_s14 = sshll.u32 (!%p241_p9), %s280_s13, 5  ;;  %s598_s17 = sshll.u32 (!%p241_p9), %s790_s0, 9 }
  0x13   : > { %s849_s20 = scalar_lea.hbm (!%p241_p9), %s905_s6, %s598_s17  ;;  %s851_s21 = scalar_lea.sflag (!%p241_p9), [#allocation4], %s280_s13 }
  0x17   : > { %s820_s11 = scalar_select %p283_p10, %s790_s0, 1 }
  0x18   : > { %s913_s10 = smov (!%p288_p11, %s587_s10), 7  ;;  %s345_s29 = smul.f32 0.3989423, %s318_s27 }
  0x19   : > { %s586_s12 = sshll.u32 %s820_s11, 3  ;;  %s588_s16 = sshll.u32 %s913_s10, 3 }
  0x1a   : > { %s286_s15 = scalar_lea.vmem %s900_s1, %s586_s12  ;;  %s291_s19 = scalar_lea.vmem %s901_s2, %s588_s16  ;;  %v346_v21 = vstv %s345_s29 }
  0x1b   : > { %v304_v1 = vld [vmem:[%s286_s15] sm:$0xff]  ;;  %s297_s22 = scalar_lea.vmem %s902_s3, %s588_s16  ;;  %v320_v3 = vld [vmem:[%s291_s19 + $0x8] sm:$0xff]  ;;  %v321_v9 = vld [vmem:[%s291_s19 + $0x10] sm:$0xff]  ;;  %s282_s15 = scalar_lea.vmem [#allocation3], %s585_s14 }
  0x1c   : > { %v306_v2 = vsel %vm305_vm0, %v304_v1, -inf  ;;  %v323_v4 = vld [vmem:[%s297_s22] sm:$0xff]  ;;  %v324_v5 = vld [vmem:[%s297_s22 + $0x8] sm:$0xff]  ;;  %v325_v6 = vld [vmem:[%s297_s22 + $0x10] sm:$0xff]  ;;  %365 = vperm.xlu1 %642, %v320_v3   ;;  %s471_s16 = sshll.u32 %s282_s15, 4  ;;  %s728_s27 = smov [#allocation3]   ;;  %s843_s16 = int_to_ptr.vmem [resolvable:$true] %s471_s16 }
  0x1d   : > { %307 = vmax.xlane.f32.xlu0 %v306_v2  ;;  %v327_v7 = vmax.f32 %v323_v4, 0.0  ;;  %v328_v8 = vmax.f32 %v324_v5, 0.0  ;;  %v329_v10 = vmax.f32 %v325_v6, 0.0  ;;  %v326_v13 = vld [vmem:[%s297_s22 + $0x18] sm:$0xff]  ;;  %v319_v20 = vld [vmem:[%s291_s19] sm:$0xff]  ;;  %s663_s22 = scalar_lea.vmem %s843_s16, 512 }
  0x1e   : > { %v322_v14 = vld [vmem:[%s291_s19 + $0x18] sm:$0xff]  ;;  %v330_v15 = vmax.f32 %v326_v13, 0.0  ;;  %p664_p12 = scmp.ne.s32.totalorder %s843_s16, %s663_s22  ;;  %s667_s29 = sshll.u32 %s728_s27, 4  ;;  %s668_s29 = int_to_ptr.vmem [resolvable:$false] %s667_s29 }
  0x1f   : > { %v331_v11 = vadd.f32 1e-06, %v327_v7  ;;  %v332_v12 = vadd.f32 1e-06, %v328_v8  ;;  %v333_v16 = vadd.f32 1e-06, %v329_v10  ;;  %p670_p1 = scmp.lt.s32.totalorder %s843_s16, %s668_s29 }
  0x20   : > { %370 = vperm.xlu1 %642, %v321_v9   ;;  %v334_v17 = vadd.f32 1e-06, %v330_v15  ;;  %p665_p13 = pnand %p664_p12, %p807_p5  ;;  %s669_s30 = scalar_lea.vmem %s668_s29, 1024 }
  0x21   : > { %643 = vrcp.f32 %v331_v11  ;;  %p671_p2 = scmp.lt.s32.totalorder %s669_s30, %s663_s22 }
  0x22   : > { %645 = vrcp.f32 %v332_v12  ;;  %p666_p0 = pneg %p665_p13 }
  0x23   : > { %647 = vrcp.f32 %v333_v16  ;;  %p672_p3 = por %p671_p2, %p670_p1 }
  0x24   : > { %375 = vperm.xlu1 %642, %v322_v14   ;;  %649 = vrcp.f32 %v334_v17 }
  0x25   : > { %p673_p4 = pnand %p672_p3, %p666_p0 }
  0x2b   : > { %v644_v18 = vpop.eup %643 }
  0x2c   : > { %384 = vperm.xlu1 %642, %v644_v18   ;;  %v646_v19 = vpop.eup %645  ;;  %v347_v23 = vmul.f32 %v644_v18, %v346_v21 }
  0x2d   : > { %v648_v22 = vpop.eup %647  ;;  %v348_v25 = vmul.f32 %v646_v19, %v346_v21 }
  0x2e   : > { %v650_v24 = vpop.eup %649  ;;  %v349_v26 = vmul.f32 %v648_v22, %v346_v21 }
  0x2f   : > { %v350_v27 = vmul.f32 %v650_v24, %v346_v21 }
  0x30   : > { %389 = vperm.xlu1 %642, %v646_v19  }
  0x33   : > { %360 = vperm.xlu0 %641, %v319_v20  }
  0x34   : > { %394 = vperm.xlu1 %642, %v648_v22  }
  0x37   : > { %424 = vperm.xlu0 %641, %v347_v23  }
  0x38   : > { %399 = vperm.xlu1 %642, %v650_v24  }
  0x3b   : > { %429 = vperm.xlu0 %641, %v348_v25  }
  0x3f   : > { %434 = vperm.xlu0 %641, %v349_v26  }
  0x43   : > { %439 = vperm.xlu0 %641, %v350_v27  }
  0x9b   : > { %v366_v28 = vpop.permute.xlu1 %365 }
  0x9c   : > { %v379_v36 = vsub.f32 %v592_v32, %v366_v28 }
  0x9f   : > { %v371_v29 = vpop.permute.xlu1 %370 }
  0xa0   : > { %v380_v38 = vsub.f32 %v592_v32, %v371_v29 }
  0xa3   : > { %v376_v30 = vpop.permute.xlu1 %375 }
  0xa4   : > { %v381_v44 = vsub.f32 %v592_v32, %v376_v30 }
  0xaa   : > { %v308_v31 = vpop.xlane.xlu0 %307 }
  0xab   : > { %v309_v33 = vsub.f32 %v304_v1, %v308_v31  ;;  %v385_v34 = vpop.permute.xlu1 %384 }
  0xad   : > { %v310_v35 = vmul.f32 1.442695, %v309_v33 }
  0xaf   : > { %651 = vpow2.f32 %v310_v35  ;;  %v390_v37 = vpop.permute.xlu1 %389 }
  0xb0   : > { %v403_v39 = vmul.f32 %v390_v37, %v379_v36 }
  0xb2   : > { %v361_v40 = vpop.permute.xlu0 %360  ;;  %v407_v41 = vmul.f32 -0.5, %v403_v39 }
  0xb3   : > { %v378_v42 = vsub.f32 %v592_v32, %v361_v40  ;;  %v395_v43 = vpop.permute.xlu1 %394 }
  0xb4   : > { %v411_v45 = vmul.f32 %v407_v41, %v403_v39  ;;  %v404_v46 = vmul.f32 %v395_v43, %v380_v38 }
  0xb5   : > { %v402_v47 = vmul.f32 %v385_v34, %v378_v42 }
  0xb6   : > { %v416_v48 = vmul.f32 1.442695, %v411_v45  ;;  %v408_v49 = vmul.f32 -0.5, %v404_v46  ;;  %v425_v51 = vpop.permute.xlu0 %424 }
  0xb7   : > { %v406_v50 = vmul.f32 -0.5, %v402_v47  ;;  %v400_v52 = vpop.permute.xlu1 %399 }
  0xb8   : > { %653 = vpow2.f32 %v416_v48  ;;  %v412_v54 = vmul.f32 %v408_v49, %v404_v46  ;;  %v405_v56 = vmul.f32 %v400_v52, %v381_v44 }
  0xb9   : > { %v838_v53 = vpop.eup %651  ;;  %v410_v55 = vmul.f32 %v406_v50, %v402_v47 }
  0xba   : > { %v312_v57 = vsel %vm305_vm0, %v838_v53, 0.0  ;;  %v418_v58 = vmul.f32 1.442695, %v412_v54  ;;  %v409_v60 = vmul.f32 -0.5, %v405_v56  ;;  %v430_v62 = vpop.permute.xlu0 %429 }
  0xbb   : > { %313 = vadd.xlane.f32.xlu1 %v312_v57  ;;  %v414_v59 = vmul.f32 1.442695, %v410_v55 }
  0xbc   : > { %655 = vpow2.f32 %v418_v58  ;;  %v413_v61 = vmul.f32 %v409_v60, %v405_v56 }
  0xbd   : > { %657 = vpow2.f32 %v414_v59 }
  0xbe   : > { %v420_v63 = vmul.f32 1.442695, %v413_v61  ;;  %v435_v1 = vpop.permute.xlu0 %434 }
  0xc0   : > { %659 = vpow2.f32 %v420_v63 }
  0xc2   : > { %v654_v0 = vpop.eup %653  ;;  %v440_v7 = vpop.permute.xlu0 %439 }
  0xc3   : > { %v443_v2 = vmul.f32 %v654_v0, %v430_v62 }
  0xc5   : > { %447 = vst [vmem:[%s282_s15 + $0x8] sm:$0xff] %v443_v2 }
  0xc6   : > { %v656_v3 = vpop.eup %655 }
  0xc7   : > { %v658_v4 = vpop.eup %657  ;;  %v444_v5 = vmul.f32 %v656_v3, %v435_v1 }
  0xc8   : > { %v442_v6 = vmul.f32 %v658_v4, %v425_v51 }
  0xc9   : > { %448 = vst [vmem:[%s282_s15 + $0x10] sm:$0xff] %v444_v5 }
  0xca   : > { %v660_v8 = vpop.eup %659  ;;  %446 = vst [vmem:[%s282_s15] sm:$0xff] %v442_v6 }
  0xcb   : > { %v445_v9 = vmul.f32 %v660_v8, %v440_v7 }
  0xcd   : > { %449 = vst [vmem:[%s282_s15 + $0x18] sm:$0xff] %v445_v9 }
  0xce   : > { %676 = shalt.err (!%p673_p4)
}
  0xcf   : > { %s677_s0 = scalar_lea.hbm %s849_s20, 512  ;;  %s681_s14 = scalar_lea.hbm %s905_s6, 1024 }
  0xd0   : > { %p678_p7 = scmp.ne.s32.totalorder %s849_s20, %s677_s0  ;;  %p682_p10 = scmp.lt.u32.totalorder %s849_s20, %s905_s6 }
  0xd1   : > { %p683_p11 = scmp.lt.u32.totalorder %s681_s14, %s677_s0  ;;  %p685_p13 = scmp.lt.u32.totalorder %s677_s0, %s849_s20 }
  0xd2   : > { %p679_p8 = pnand %p678_p7, %p807_p5 }
  0xd3   : > { %p684_p12 = por %p683_p11, %p682_p10 }
  0xd4   : > { %p680_p9 = pneg %p679_p8 }
  0xd5   : > { %p686_p0 = por %p685_p13, %p684_p12 }
  0xd7   : > { %p687_p1 = pnand %p686_p0, %p680_p9 }
  0xd9   : > { %690 = shalt.err (!%p687_p1)
}
  0xda   : > { %s729_s18 = smov 128   ;;  %s730_s19 = smov 8  }
  0xdb   : > { %599 = dma.vmem_to_hbm [thread:$0]  (%p807_p5), %s843_s16, 512, %s849_s20, %s851_s21, %s729_s18, %s729_s18, %s730_s19  }
  0xdc   : > { %s302_s29 = scalar_lea.vmem %s904_s5, %s586_s12 }
 0x148   : > { %v314_v10 = vpop.xlane.xlu1 %313 }
 0x149   : > { %661 = vrcp.f32 %v314_v10 }
 0x153   : > { %v662_v11 = vpop.eup %661 }
 0x154   : > { %v316_v12 = vmul.f32 %v662_v11, %v838_v53 }
 0x156   : > { %317 = vst.msk [vmem:[%s302_s29] sm:$0xff] %vm305_vm0, %v316_v12 }
 0x157 PF: > { %p605_p2 = scmp.ge.s32.totalorder %s725_s26, 2  ;;  %s493_s30 = sand.u32 1, %s713_s23  }
 0x158   : > { %s494_s8 = scalar_lea.sflag [#allocation4], %s493_s30 }
 0x159   : > { %p602_p5 = pnand %p605_p2, %p811_p6 }
 0x15b   : > { %708 = dma.done.wait (!%p602_p5), %s494_s8, 512  }
 0x15c   : > { %710 = vsyncadd (!%p602_p5), %s494_s8, 4294966784  ;;  %p18_p3 = scmp.ge.s32.totalorder %s794_s28, 4   ;;  %s908_s23 = smov %s717_s24 }
 0x15d   : > { %s909_s24 = smov %s721_s25  ;;  %s910_s25 = smov %s805_s7 }
 0x15e   : > { %s911_s26 = smov %s794_s28  ;;  %20 = sbr.rel (!%p18_p3) target bundleno = 5 (0x5), region = 93 }
 0x165   :  { %499 = vsyncpa [#allocation4], 1 }
 0x166   :  { %501 = vsyncpa [#allocation4 + $0x1], 1 }

</bundles_post_ra>
